<compile_context>
chip_gen: v6e
topology: v6e:2x2x1
jax: 0.10.0
libtpu: 0.0.40
codegen_flags: <defaults>
</compile_context>

<pallas_src>
import functools

import jax
import jax.numpy as jnp
from jax.experimental import pallas as pl
from jax.experimental.pallas import tpu as pltpu


# ---------------------------------------------------------------------------
# Fused Pallas kernel: all conv layers + optional pooling for one batch tile
# ---------------------------------------------------------------------------
def _fused_cnn_kernel(*refs, dims, p0, s_rows, tb, pooling, compute_dtype):
    """refs = (x_ref, w_blk_0, bias_0, ..., w_blk_{L-1}, bias_{L-1}, out_ref)

    x_ref   : (tb*s_rows, p0*C0) bf16; each row holds p0 consecutive timesteps
              of one sample, time-major / channel-fastest.
    w_blk_l : (P_l*C_l, (P_l/2)*C_{l+1}) bf16 block-diagonal tap-fused weight.
    bias_l  : (1, (P_l/2)*C_{l+1}) f32 (bias tiled over the packed groups).
    """
    num_layers = len(dims) - 1
    x_ref = refs[0]
    w_refs = refs[1:1 + 2 * num_layers]
    out_ref = refs[1 + 2 * num_layers]

    cur = x_ref[...]                                   # bf16, lane-dense rows
    p = p0
    y = None
    for layer in range(num_layers):
        w = w_refs[2 * layer][...]                     # resident bf16 weight
        b = w_refs[2 * layer + 1][...]                 # (1, width_out) f32
        acc = jnp.dot(cur, w, preferred_element_type=jnp.float32)
        y = jnp.maximum(acc + b, 0.0)                  # bias + ReLU in f32
        p //= 2                                        # timesteps per row halve
        if layer < num_layers - 1:
            cur = y.astype(compute_dtype)              # bf16 feeds next MXU pass

    c_f = dims[-1]
    if pooling is None:
        out_ref[...] = y.astype(out_ref.dtype)         # lane-dense slab store
    else:
        # Single fused reduction over the whole remaining length per sample.
        y3 = y.reshape(tb, s_rows * p, c_f)            # (tb, l_f, C_f)
        if pooling == "average":
            red = jnp.mean(y3, axis=1)
        else:                                          # "max"
            red = jnp.max(y3, axis=1)
        out_ref[...] = red.astype(out_ref.dtype)


# ---------------------------------------------------------------------------
# Wrapper helpers
# ---------------------------------------------------------------------------
def _vmem_capacity_bytes():
    try:
        info = pltpu.get_tpu_info()
    except Exception:
        return 64 * 1024 * 1024
    for attr in ("vmem_capacity_bytes", "vmem_size_bytes", "vmem_bytes"):
        val = getattr(info, attr, None)
        if val:
            return int(val)
    return 64 * 1024 * 1024


def _choose_row_timesteps(l_f, dims):
    """Timesteps packed per activation row.

    Largest multiple of 2^num_layers dividing l_in such that every layer's
    block-diagonal matmul stays within one 128-wide MXU tile (no wasted FLOPs
    on zero blocks).  Falls back to 2^num_layers (plain tap fusion)."""
    num_layers = len(dims) - 1
    base = 1 << num_layers
    best = base
    for d in range(1, l_f + 1):
        if l_f % d:
            continue
        p0 = d * base
        ok = True
        for l in range(num_layers):
            p = p0 >> l
            if p * dims[l] > 128 or (p // 2) * dims[l + 1] > 128:
                ok = False
                break
        if ok:
            best = max(best, p0)
    return best


def _pick_block_batch(n, s_rows, per_sample_bytes, budget_bytes):
    """Largest batch tile that fits the VMEM budget, keeps blocks sublane
    aligned (bf16 rows multiple of 16) and gives grid >= 2 when possible."""
    aligned = [tb for tb in range(8, n, 8)
               if n % tb == 0 and (tb * s_rows) % 16 == 0]
    fitting = [tb for tb in aligned if tb * per_sample_bytes <= budget_bytes]
    if fitting:
        return max(fitting)
    if aligned:
        return min(aligned)
    return n                                            # whole batch, grid = 1


# ---------------------------------------------------------------------------
# Wrapper
# ---------------------------------------------------------------------------
def cnn_forward(params, x, pooling=None, *, block_batch=None,
                compute_dtype=jnp.bfloat16, out_dtype=jnp.float32):
    """Full CNN forward.  x: (N, C, L) float32, PyTorch NCL layout."""
    num_layers = len(params)
    n, c0, l0 = x.shape
    dims = (c0,) + tuple(int(w.shape[0]) for w, _ in params)
    c_f = dims[-1]

    # PyTorch Conv1d(k=2, s=2) drops a trailing element whenever the running
    # length is odd; one up-front crop is equivalent.
    l_f = l0 >> num_layers
    if l_f == 0:
        raise ValueError("input length too short for this CNN depth")
    l_in = l_f << num_layers
    x = x[:, :, :l_in]

    p0 = _choose_row_timesteps(l_f, dims)     # timesteps per activation row
    s_rows = l_in // p0                       # rows per sample
    p_f = p0 >> num_layers                    # output timesteps per row

    # Single NCL -> (rows, p0*C0) relayout + bf16 cast: the only XLA layout op
    # on the activation input path.
    x2d = (jnp.transpose(x, (0, 2, 1))
           .reshape(n * s_rows, p0 * c0)
           .astype(compute_dtype))

    # Resident per-layer weights: tap-fused then block-diagonally group-packed.
    flat_params = []
    in_specs = [None]                         # slot 0 = x2d spec, filled below
    p = p0
    for (w, b) in params:
        c_out = w.shape[0]
        wt = jnp.concatenate([w[:, :, 0].T, w[:, :, 1].T], axis=0)  # (2C_in, C_out)
        groups = p // 2
        w_blk = jnp.kron(jnp.eye(groups, dtype=jnp.float32),
                         wt.astype(jnp.float32)).astype(compute_dtype)
        b_row = jnp.tile(b.reshape(1, -1).astype(jnp.float32), (1, groups))
        flat_params += [w_blk, b_row]
        in_specs += [pl.BlockSpec(tuple(w_blk.shape), lambda i: (0, 0)),
                     pl.BlockSpec(tuple(b_row.shape), lambda i: (0, 0))]
        p //= 2

    # ---- VMEM-budget-aware batch tile ------------------------------------
    vmem_cap = _vmem_capacity_bytes()                       # per-generation
    budget = vmem_cap // 3
    vmem_limit = min((vmem_cap * 3) // 4, 96 * 1024 * 1024)

    per_sample = l_in * c0 * 2 * 2                          # bf16 in, dbl-buffered
    l_cur = l_in
    for l in range(num_layers):
        l_cur //= 2
        per_sample += l_cur * dims[l + 1] * 4               # f32 activation value
    per_sample += (l_f * c_f if pooling is None else c_f) * 4 * 2

    if block_batch is None:
        tb = _pick_block_batch(n, s_rows, per_sample, budget)
    else:
        tb = int(block_batch)
        if n % tb != 0:
            raise ValueError("block_batch must divide the batch size")
        if tb != n and (tb % 8 != 0 or (tb * s_rows) % 16 != 0):
            raise ValueError("block_batch must keep blocks sublane-aligned "
                             "(tb multiple of 8 and tb*rows_per_sample "
                             "multiple of 16) or equal the batch size")
    grid = (n // tb,)
    rows_blk = tb * s_rows

    in_specs[0] = pl.BlockSpec((rows_blk, p0 * c0), lambda i: (i, 0))

    if pooling is None:
        out_shape = jax.ShapeDtypeStruct((n * s_rows, p_f * c_f), out_dtype)
        out_spec = pl.BlockSpec((rows_blk, p_f * c_f), lambda i: (i, 0))
        out_elems = n * l_f * c_f
    else:
        out_shape = jax.ShapeDtypeStruct((n, c_f), out_dtype)
        out_spec = pl.BlockSpec((tb, c_f), lambda i: (i, 0))
        out_elems = n * c_f

    # Advisory cost estimate (useful conv FLOPs; bf16 input bytes).
    flops = 0
    l_cur = l_in
    for l in range(num_layers):
        l_cur //= 2
        flops += 2 * (n * l_cur) * (2 * dims[l]) * dims[l + 1]
    weight_bytes = sum(int(a.size) * a.dtype.itemsize for a in flat_params)
    bytes_accessed = int(x2d.size) * 2 + out_elems * 4 + weight_bytes

    kernel = functools.partial(
        _fused_cnn_kernel, dims=dims, p0=p0, s_rows=s_rows, tb=tb,
        pooling=pooling, compute_dtype=compute_dtype)

    out2d = pl.pallas_call(
        kernel,
        out_shape=out_shape,
        grid=grid,
        in_specs=in_specs,
        out_specs=out_spec,
        compiler_params=pltpu.CompilerParams(
            dimension_semantics=("parallel",),
            vmem_limit_bytes=vmem_limit),
        cost_estimate=pl.CostEstimate(
            flops=flops, transcendentals=0, bytes_accessed=bytes_accessed),
    )(x2d, *flat_params)

    if pooling is None:
        # back to PyTorch NCL layout (tiny final output, single XLA transpose)
        return out2d.reshape(n, s_rows * p_f, c_f).transpose(0, 2, 1)
    return out2d


class CNNPallas:
    """Pallas equivalent of the PyTorch CNN module (p_drop=0.0, act=ReLU)."""

    def __init__(self, dims, key, compute_dtype=jnp.bfloat16):
        self.dims = list(dims)
        self.params = []
        for l in range(len(dims) - 1):
            key, kw, kb = jax.random.split(key, 3)
            fan_in = dims[l] * 2  # C_in * kernel_size (PyTorch default init)
            bound = 1.0 / float(fan_in) ** 0.5
            w = jax.random.uniform(
                kw, (dims[l + 1], dims[l], 2), jnp.float32, -bound, bound)
            b = jax.random.uniform(kb, (dims[l + 1],), jnp.float32, -bound, bound)
            self.params.append((w, b))

        def _fwd(params, x, pooling=None, block_batch=None):
            return cnn_forward(params, x, pooling=pooling,
                               block_batch=block_batch,
                               compute_dtype=compute_dtype)

        self._fwd = jax.jit(_fwd, static_argnames=("pooling", "block_batch"))

    def __call__(self, x, pooling=None, block_batch=None):
        return self._fwd(self.params, x, pooling=pooling, block_batch=block_batch)


# ---------------------------------------------------------------------------
# Pure-JAX reference (mirrors the bf16-input / f32-accumulate numerics)
# ---------------------------------------------------------------------------
def _ref_forward(params, x, pooling=None, compute_dtype=jnp.bfloat16):
    nl = len(params)
    l0 = x.shape[-1]
    x = x[:, :, :(l0 >> nl) << nl]
    for w, b in params:
        n, c_in, l = x.shape
        c_out = w.shape[0]
        l_out = l // 2
        x2 = (x.reshape(n, c_in, l_out, 2)
              .transpose(0, 2, 1, 3)
              .reshape(n * l_out, 2 * c_in))
        wf = w.reshape(c_out, 2 * c_in).T
        x2c = x2.astype(compute_dtype).astype(jnp.float32)
        wfc = wf.astype(compute_dtype).astype(jnp.float32)
        y = x2c @ wfc + b
        x = jnp.maximum(y, 0.0).reshape(n, l_out, c_out).transpose(0, 2, 1)
    if pooling == "average":
        x = jnp.mean(x, axis=-1)
    elif pooling == "max":
        x = jnp.max(x, axis=-1)
    return x


if __name__ == "__main__":
    key = jax.random.PRNGKey(0)
    key, kx = jax.random.split(key)

    dims = [4, 8, 16]                       # CNN([4, 8, 16])
    N, L = 16, 32                           # (batch=16, channels=4, length=32)
    x = jax.random.normal(kx, (N, dims[0], L), jnp.float32)

    model = CNNPallas(dims, key)

    out_none = model(x, pooling=None)       # (16, 16, 8)
    out_avg = model(x, pooling="average")   # (16, 16)
    out_max = model(x, pooling="max")       # (16, 16)
    jax.block_until_ready((out_none, out_avg, out_max))

    ref_none = _ref_forward(model.params, x, None)
    ref_avg = _ref_forward(model.params, x, "average")
    ref_max = _ref_forward(model.params, x, "max")

    assert out_none.shape == (N, dims[-1], L >> 2)
    assert out_avg.shape == (N, dims[-1])
    assert out_max.shape == (N, dims[-1])
    # bf16 MXU inputs / f32 accumulation -> loosened tolerance vs f32 reference
    assert jnp.allclose(out_none, ref_none, atol=1e-2, rtol=1e-2)
    assert jnp.allclose(out_avg, ref_avg, atol=1e-2, rtol=1e-2)
    assert jnp.allclose(out_max, ref_max, atol=1e-2, rtol=1e-2)

    print("KERNEL_OK")
</pallas_src>

<mosaic_0001>
module attributes {stable_mosaic.version = 11 : i64} {
  func.func @_fused_cnn_kernel(%arg0: i32, %arg1: memref<16x128xbf16, #tpu.memory_space<vmem>>, %arg2: memref<128x128xbf16, #tpu.memory_space<vmem>>, %arg3: memref<1x128xf32, #tpu.memory_space<vmem>>, %arg4: memref<128x128xbf16, #tpu.memory_space<vmem>>, %arg5: memref<1x128xf32, #tpu.memory_space<vmem>>, %arg6: memref<16x128xf32, #tpu.memory_space<vmem>>) attributes {dimension_semantics = [#tpu.dimension_semantics<parallel>], iteration_bounds = array<i64: 1>, scalar_prefetch = 0 : i64, scratch_operands = 0 : i64, tpu.core_type = #tpu.core_type<tc>, window_params = [{transform_indices = @transform_0, window_bounds = array<i64: 16, 128>}, {pipeline_mode = #tpu.pipeline_mode<synchronous>, transform_indices = @transform_1, window_bounds = array<i64: 128, 128>}, {pipeline_mode = #tpu.pipeline_mode<synchronous>, transform_indices = @transform_2, window_bounds = array<i64: 1, 128>}, {pipeline_mode = #tpu.pipeline_mode<synchronous>, transform_indices = @transform_3, window_bounds = array<i64: 128, 128>}, {pipeline_mode = #tpu.pipeline_mode<synchronous>, transform_indices = @transform_4, window_bounds = array<i64: 1, 128>}, {transform_indices = @transform_5, window_bounds = array<i64: 16, 128>}]} {
    %c0 = arith.constant 0 : index
    %c0_0 = arith.constant 0 : index
    %0 = vector.load %arg1[%c0, %c0_0] : memref<16x128xbf16, #tpu.memory_space<vmem>>, vector<16x128xbf16>
    %c0_1 = arith.constant 0 : index
    %c0_2 = arith.constant 0 : index
    %1 = vector.load %arg2[%c0_1, %c0_2] : memref<128x128xbf16, #tpu.memory_space<vmem>>, vector<128x128xbf16>
    %c0_3 = arith.constant 0 : index
    %c0_4 = arith.constant 0 : index
    %2 = vector.load %arg3[%c0_3, %c0_4] : memref<1x128xf32, #tpu.memory_space<vmem>>, vector<1x128xf32>
    %cst = arith.constant dense<0.000000e+00> : vector<16x128xf32>
    %3 = tpu.matmul %0, %1, %cst {dimension_numbers = #tpu.dot_dimension_numbers<[1], [0], [0], [1], [0, 0, 1, 1], [], []>} : vector<16x128xbf16>, vector<128x128xbf16>, vector<16x128xf32> -> vector<16x128xf32>
    %4 = vector.broadcast %2 : vector<1x128xf32> to vector<16x128xf32>
    %5 = arith.addf %3, %4 : vector<16x128xf32>
    %cst_5 = arith.constant 0.000000e+00 : f32
    %6 = vector.broadcast %cst_5 : f32 to vector<16x128xf32>
    %7 = arith.maximumf %5, %6 : vector<16x128xf32>
    %8 = arith.truncf %7 : vector<16x128xf32> to vector<16x128xbf16>
    %c0_6 = arith.constant 0 : index
    %c0_7 = arith.constant 0 : index
    %9 = vector.load %arg4[%c0_6, %c0_7] : memref<128x128xbf16, #tpu.memory_space<vmem>>, vector<128x128xbf16>
    %c0_8 = arith.constant 0 : index
    %c0_9 = arith.constant 0 : index
    %10 = vector.load %arg5[%c0_8, %c0_9] : memref<1x128xf32, #tpu.memory_space<vmem>>, vector<1x128xf32>
    %cst_10 = arith.constant dense<0.000000e+00> : vector<16x128xf32>
    %11 = tpu.matmul %8, %9, %cst_10 {dimension_numbers = #tpu.dot_dimension_numbers<[1], [0], [0], [1], [0, 0, 1, 1], [], []>} : vector<16x128xbf16>, vector<128x128xbf16>, vector<16x128xf32> -> vector<16x128xf32>
    %12 = vector.broadcast %10 : vector<1x128xf32> to vector<16x128xf32>
    %13 = arith.addf %11, %12 : vector<16x128xf32>
    %cst_11 = arith.constant 0.000000e+00 : f32
    %14 = vector.broadcast %cst_11 : f32 to vector<16x128xf32>
    %15 = arith.maximumf %13, %14 : vector<16x128xf32>
    %c0_12 = arith.constant 0 : index
    %c0_13 = arith.constant 0 : index
    %16 = vector.load %arg6[%c0_12, %c0_13] : memref<16x128xf32, #tpu.memory_space<vmem>>, vector<16x128xf32>
    tpu.vector_store %arg6[%c0_12, %c0_13], %15 {strides = array<i32>} : memref<16x128xf32, #tpu.memory_space<vmem>>, vector<16x128xf32>,
    return
  }
  func.func @transform_0(%arg0: i32) -> (i32, i32) {
    %c0_i32 = arith.constant 0 : i32
    %c0_i32_0 = arith.constant 0 : i32
    return %arg0, %c0_i32 : i32, i32
  }
  func.func @transform_1(%arg0: i32) -> (i32, i32) {
    %c0_i32 = arith.constant 0 : i32
    %c0_i32_0 = arith.constant 0 : i32
    %c0_i32_1 = arith.constant 0 : i32
    return %c0_i32, %c0_i32_0 : i32, i32
  }
  func.func @transform_2(%arg0: i32) -> (i32, i32) {
    %c0_i32 = arith.constant 0 : i32
    %c0_i32_0 = arith.constant 0 : i32
    %c0_i32_1 = arith.constant 0 : i32
    return %c0_i32, %c0_i32_0 : i32, i32
  }
  func.func @transform_3(%arg0: i32) -> (i32, i32) {
    %c0_i32 = arith.constant 0 : i32
    %c0_i32_0 = arith.constant 0 : i32
    %c0_i32_1 = arith.constant 0 : i32
    return %c0_i32, %c0_i32_0 : i32, i32
  }
  func.func @transform_4(%arg0: i32) -> (i32, i32) {
    %c0_i32 = arith.constant 0 : i32
    %c0_i32_0 = arith.constant 0 : i32
    %c0_i32_1 = arith.constant 0 : i32
    return %c0_i32, %c0_i32_0 : i32, i32
  }
  func.func @transform_5(%arg0: i32) -> (i32, i32) {
    %c0_i32 = arith.constant 0 : i32
    %c0_i32_0 = arith.constant 0 : i32
    return %arg0, %c0_i32 : i32, i32
  }
}

</mosaic_0001>

<bundles_post_ra>
// kernel: _fwd.1
= control target key start
LH: loop header
LB: loop body
LE: loop exit
PB: predicated region body
PF: predicated region fallthrough
CT: control target
= control target key end

     0   :  { %v360_v0 = vmov 0.0   ;;  %vm361_vm0 = vmmov 0   ;;  %s455_s1 = inlined_call_operand.vmem [shape: bf16[128,128], index: 1, kind: input, shape index: {}]   ;;  %s456_s3 = inlined_call_operand.vmem [shape: bf16[128,128], index: 3, kind: input, shape index: {}]   ;;  %s457_s0 = inlined_call_operand.vmem [shape: bf16[16,128], index: 0, kind: input, shape index: {}]   ;;  %s458_s2 = inlined_call_operand.vmem [shape: f32[1,128], index: 2, kind: input, shape index: {}]   ;;  %s459_s4 = inlined_call_operand.vmem [shape: f32[1,128], index: 4, kind: input, shape index: {}]   ;;  %s460_s5 = inlined_call_operand.vmem [shape: f32[16,128], index: 5, kind: output, shape index: {}]  }
   0x1   :  { %301 = vmatprep.subr.bf16.mxu0 %v360_v0  ;;  %v343_v1 = vld [vmem:[%s455_s1 + $0x38] sm:$0xff]   ;;  %317 = vmatprep.mubr.msk.bf16.mxu0 %vm361_vm0, %v360_v0  ;;  %v344_v2 = vld [vmem:[%s455_s1 + $0x30] sm:$0xff]   ;;  %v345_v3 = vld [vmem:[%s455_s1 + $0x28] sm:$0xff]  }
   0x2   :  { %321 = vmatprep.subr.bf16.mxu1 %v360_v0  ;;  %337 = vmatprep.mubr.msk.bf16.mxu1 %vm361_vm0, %v360_v0  ;;  %v352_v4 = vld [vmem:[%s456_s3 + $0x38] sm:$0xff]   ;;  %v346_v5 = vld [vmem:[%s455_s1 + $0x20] sm:$0xff]   ;;  %v353_v6 = vld [vmem:[%s456_s3 + $0x30] sm:$0xff]  }
   0x3   :  { %302 = vmatpush3.bf16.msra.mxu0 %v343_v1  ;;  %322 = vmatpush3.bf16.msra.mxu1 %v352_v4  ;;  %v347_v7 = vld [vmem:[%s455_s1 + $0x18] sm:$0xff]   ;;  %v354_v8 = vld [vmem:[%s456_s3 + $0x28] sm:$0xff]   ;;  %v348_v9 = vld [vmem:[%s455_s1 + $0x10] sm:$0xff]  }
   0x4   :  { %303 = vmatprep.subr.bf16.mxu0 %v360_v0  ;;  %323 = vmatprep.subr.bf16.mxu1 %v360_v0  ;;  %v355_v10 = vld [vmem:[%s456_s3 + $0x20] sm:$0xff]   ;;  %v349_v11 = vld [vmem:[%s455_s1 + $0x8] sm:$0xff]   ;;  %v356_v12 = vld [vmem:[%s456_s3 + $0x18] sm:$0xff]  }
   0x5   :  { %v350_v13 = vld [vmem:[%s455_s1] sm:$0xff]   ;;  %v357_v15 = vld [vmem:[%s456_s3 + $0x10] sm:$0xff]   ;;  %v358_v16 = vld [vmem:[%s456_s3 + $0x8] sm:$0xff]  }
   0x6   :  { %v351_v14 = vld [vmem:[%s457_s0] sm:$0xff]  }
   0x7   :  { %304 = vmatpush3.bf16.msra.mxu0 %v344_v2  ;;  %324 = vmatpush3.bf16.msra.mxu1 %v353_v6  ;;  %v359_v17 = vld [vmem:[%s456_s3] sm:$0xff]  }
   0x8   :  { %305 = vmatprep.subr.bf16.mxu0 %v360_v0  ;;  %325 = vmatprep.subr.bf16.mxu1 %v360_v0  ;;  %v264_v18 = vld [vmem:[%s458_s2] ss:$0 sm:$0xff] }
   0x9   :  { %v274_v28 = vld [vmem:[%s459_s4] ss:$0 sm:$0xff] }
   0xb   :  { %306 = vmatpush3.bf16.msra.mxu0 %v345_v3  ;;  %326 = vmatpush3.bf16.msra.mxu1 %v354_v8 }
   0xc   :  { %307 = vmatprep.subr.bf16.mxu0 %v360_v0  ;;  %327 = vmatprep.subr.bf16.mxu1 %v360_v0 }
   0xf   :  { %308 = vmatpush3.bf16.msra.mxu0 %v346_v5  ;;  %328 = vmatpush3.bf16.msra.mxu1 %v355_v10 }
  0x10   :  { %309 = vmatprep.subr.bf16.mxu0 %v360_v0  ;;  %329 = vmatprep.subr.bf16.mxu1 %v360_v0 }
  0x13   :  { %310 = vmatpush3.bf16.msra.mxu0 %v347_v7  ;;  %330 = vmatpush3.bf16.msra.mxu1 %v356_v12 }
  0x14   :  { %311 = vmatprep.subr.bf16.mxu0 %v360_v0  ;;  %331 = vmatprep.subr.bf16.mxu1 %v360_v0 }
  0x17   :  { %312 = vmatpush3.bf16.msra.mxu0 %v348_v9  ;;  %332 = vmatpush3.bf16.msra.mxu1 %v357_v15 }
  0x18   :  { %313 = vmatprep.subr.bf16.mxu0 %v360_v0  ;;  %333 = vmatprep.subr.bf16.mxu1 %v360_v0 }
  0x1b   :  { %314 = vmatpush3.bf16.msra.mxu0 %v349_v11  ;;  %334 = vmatpush3.bf16.msra.mxu1 %v358_v16 }
  0x1c   :  { %315 = vmatprep.subr.bf16.mxu0 %v360_v0  ;;  %335 = vmatprep.subr.bf16.mxu1 %v360_v0 }
  0x1f   :  { %316 = vmatpush3.bf16.msra.mxu0 %v350_v13  ;;  %336 = vmatpush3.bf16.msra.mxu1 %v359_v17 }
  0x22   :  { %318 = vmatmul.mubr.bf16.vlgmr.msra.gmra.mxu0 %v351_v14 }
  0xe2   :  { %v134_v19 = vpop.f32.mrf.mxu0 }
  0xe3   :  { %v135_v21 = vadd.f32 %v264_v18, %v134_v19 }
  0xe4   :  { %v319_v20 = vpop.f32.mrf.mxu0 }
  0xe5   :  { %v141_v25 = vmax.f32 %v135_v21, 0.0 }
  0xe6   :  { %v137_v22 = vpop.f32.mrf.mxu0 }
  0xe7   :  { %v138_v23 = vadd.f32 %v264_v18, %v137_v22 }
  0xe8   :  { %v320_v24 = vpop.f32.mrf.mxu0 }
  0xe9   :  { %v142_v26 = vmax.f32 %v138_v23, 0.0 }
  0xeb   :  { %v143_v27 = vpack.c.bf16 %v142_v26, %v141_v25 }
  0xed   :  { %338 = vmatmul.mubr.bf16.vlgmr.msra.gmra.mxu1 %v143_v27 }
 0x1ad   :  { %v249_v29 = vpop.f32.mrf.mxu1 }
 0x1ae   :  { %v250_v30 = vadd.f32 %v274_v28, %v249_v29 }
 0x1af   :  { %v339_v31 = vpop.f32.mrf.mxu1 }
 0x1b0   :  { %v256_v32 = vmax.f32 %v250_v30, 0.0 }
 0x1b1   :  { %v252_v33 = vpop.f32.mrf.mxu1 }
 0x1b2   :  { %258 = vst [vmem:[%s460_s5] sm:$0xff] %v256_v32  ;;  %v253_v34 = vadd.f32 %v274_v28, %v252_v33 }
 0x1b3   :  { %v340_v35 = vpop.f32.mrf.mxu1 }
 0x1b4   :  { %v257_v36 = vmax.f32 %v253_v34, 0.0 }
 0x1b6   :  { %259 = vst [vmem:[%s460_s5 + $0x8] sm:$0xff] %v257_v36 }

</bundles_post_ra>
